<compile_context>
chip_gen: v6e
topology: v6e:2x2x1
jax: 0.10.0
libtpu: 0.0.40
codegen_flags: <defaults>
</compile_context>

<pallas_src>
import functools

import jax
import jax.numpy as jnp
from jax.experimental import pallas as pl
from jax.experimental.pallas import tpu as pltpu

SMPL_DOWN = jnp.array([0, 1, 2, 4, 5, 7, 8, 10, 11], dtype=jnp.int32)
SMPL_UP = jnp.array([3, 6, 9, 12, 13, 14, 15, 16, 17, 18, 19, 20, 21, 22, 23],
                    dtype=jnp.int32)

JOINT_CHANNEL = 3      # hps.joint_channel
WIDTH = 32             # conv width of the synthetic VQVAE halves
EMB_WIDTH = 32         # codebook embedding width
L_BINS = 64            # codebook size
K_PAD = 128            # codebook rows padded to a full 128-lane vreg
C_PAD = 128            # joint-channel dim padded -> lane-dense GEMM K/N & stores
COMMIT_W = 0.02
VEL_W = 1.0
ACC_W = 1.0


# --------------------------------------------------------------------------
# In-kernel helpers (all 2-D: one (half, batch) slice per grid step)
# --------------------------------------------------------------------------

def _mm(a, w):
    """(M, K) x (K, N) -> (M, N); bf16 MXU operands, f32 accumulation."""
    return jnp.dot(a.astype(jnp.bfloat16), w.astype(jnp.bfloat16),
                   preferred_element_type=jnp.float32)


def _shift_down(v):
    """rows m -> m+1 with a zero row at m=0 (i.e. returns v[m-1])."""
    z = jnp.zeros_like(v[:1])
    return jnp.concatenate([z, v[:-1]], axis=0)


def _shift_up(v):
    """rows m -> m-1 with a zero row at the end (i.e. returns v[m+1])."""
    z = jnp.zeros_like(v[:1])
    return jnp.concatenate([v[1:], z], axis=0)


# --------------------------------------------------------------------------
# Fused VQVAE-half kernel (encoder -> VQ -> decoder), grid = (2 halves, B)
# --------------------------------------------------------------------------
# TODO(synk): the original VQVAE/VQVAER submodule code is not part of the given
# source; implemented here as a single-level strided-conv encoder, VQ
# bottleneck and transposed-conv decoder (forward only; no straight-through /
# codebook-update gradients).

def _fused_vqvae_kernel(x_ev_ref, x_od_ref,
                        ew1_ref, eb1_ref, ew2_ref, eb2_ref,
                        dw1_ref, db1_ref, dw2_ref, db2_ref,
                        cb_ref, cbt_ref, e2_ref,
                        xout_ref, commit_ref, *, t_out):
    x_ev = x_ev_ref[...]            # (T/2+1, C_PAD) bf16 : padded even time pos.
    x_od = x_od_ref[...]            # (T/2+1, C_PAD) bf16 : padded odd time pos.

    # ---- encoder conv1: Conv1d(C, W, k=4, s=2, p=1) as 4 shifted GEMMs ----
    # y[m] = w0*x[2m-1] + w1*x[2m] + w2*x[2m+1] + w3*x[2m+2]
    h = (eb1_ref[...].astype(jnp.float32)
         + _mm(x_ev[0:t_out], ew1_ref[0])
         + _mm(x_od[0:t_out], ew1_ref[1])
         + _mm(x_ev[1:t_out + 1], ew1_ref[2])
         + _mm(x_od[1:t_out + 1], ew1_ref[3]))
    h = jnp.maximum(h, 0.0)                                   # (T/2, W) f32
    hb = h.astype(jnp.bfloat16)

    # ---- encoder conv2: Conv1d(W, D, k=3, s=1, p=1) ----
    z_e = (eb2_ref[...].astype(jnp.float32)
           + _mm(_shift_down(hb), ew2_ref[0])
           + _mm(hb, ew2_ref[1])
           + _mm(_shift_up(hb), ew2_ref[2]))                  # (T/2, D) f32

    # ---- VQ bottleneck (|x|^2 dropped; codebook padded to 128 rows) ----
    dots = _mm(z_e, cbt_ref[...])                             # (T/2, K_PAD) f32
    dist = e2_ref[...].astype(jnp.float32) - 2.0 * dots
    min_d = jnp.min(dist, axis=-1, keepdims=True)
    iota = jax.lax.broadcasted_iota(jnp.int32, dist.shape, 1)
    codes = jnp.min(jnp.where(dist <= min_d, iota, K_PAD), axis=-1,
                    keepdims=True)                            # first nearest code
    onehot = (iota == codes).astype(jnp.bfloat16)             # (T/2, K_PAD)
    z_q = _mm(onehot, cb_ref[...])                            # (T/2, D) f32
    commit = jnp.mean((z_e - z_q) ** 2)

    # ---- decoder conv1: Conv1d(D, W, k=3, s=1, p=1) + ReLU ----
    zqb = z_q.astype(jnp.bfloat16)
    g = (db1_ref[...].astype(jnp.float32)
         + _mm(_shift_down(zqb), dw1_ref[0])
         + _mm(zqb, dw1_ref[1])
         + _mm(_shift_up(zqb), dw1_ref[2]))
    g = jnp.maximum(g, 0.0)
    gb = g.astype(jnp.bfloat16)

    # ---- decoder ConvTranspose1d(W, C, k=4, s=2, p=1) via polyphase GEMMs ----
    # PyTorch convention (y[n] += g[m]*w[j] with n = 2m + j - 1):
    #   y[2m]   = b + g[m]*w1 + g[m-1]*w3
    #   y[2m+1] = b + g[m]*w2 + g[m+1]*w0
    b2 = db2_ref[...].astype(jnp.float32)
    y_ev = b2 + _mm(gb, dw2_ref[1]) + _mm(_shift_down(gb), dw2_ref[3])
    y_od = b2 + _mm(gb, dw2_ref[2]) + _mm(_shift_up(gb), dw2_ref[0])

    xout_ref[0] = y_ev                                        # even output timesteps
    xout_ref[1] = y_od                                        # odd output timesteps
    commit_ref[...] = jnp.broadcast_to(commit, (1, K_PAD)).astype(jnp.float32)


# --------------------------------------------------------------------------
# Parameter construction / packing (padded, bf16-cast, stacked over halves)
# --------------------------------------------------------------------------

def _init_conv(key, k, cin, cout):
    kw, kb = jax.random.split(key)
    scale = 1.0 / jnp.sqrt(jnp.float32(k * cin))
    w = jax.random.normal(kw, (k, cin, cout), jnp.float32) * scale
    b = jax.random.normal(kb, (cout,), jnp.float32) * scale
    return w, b


def init_vqvae_params(key, c_in):
    keys = jax.random.split(key, 5)
    p = {}
    p['enc_w1'], p['enc_b1'] = _init_conv(keys[0], 4, c_in, WIDTH)
    p['enc_w2'], p['enc_b2'] = _init_conv(keys[1], 3, WIDTH, EMB_WIDTH)
    p['dec_w1'], p['dec_b1'] = _init_conv(keys[2], 3, EMB_WIDTH, WIDTH)
    p['dec_w2'], p['dec_b2'] = _init_conv(keys[3], 4, WIDTH, c_in)
    p['codebook'] = jax.random.normal(keys[4], (L_BINS, EMB_WIDTH),
                                      jnp.float32) * 0.1
    return p


def _pad_axis(a, axis, size):
    pad = [(0, 0)] * a.ndim
    pad[axis] = (0, size - a.shape[axis])
    return jnp.pad(a, pad)


def pack_params(params_up, params_down):
    """Pad per-half params to common lane-friendly sizes and stack on axis 0."""
    def stack(fn):
        return jnp.stack([fn(params_up), fn(params_down)], axis=0)

    packed = {}
    packed['ew1'] = stack(lambda p: _pad_axis(p['enc_w1'], 1, C_PAD)).astype(jnp.bfloat16)
    packed['eb1'] = stack(lambda p: p['enc_b1'][None, :])
    packed['ew2'] = stack(lambda p: p['enc_w2']).astype(jnp.bfloat16)
    packed['eb2'] = stack(lambda p: p['enc_b2'][None, :])
    packed['dw1'] = stack(lambda p: p['dec_w1']).astype(jnp.bfloat16)
    packed['db1'] = stack(lambda p: p['dec_b1'][None, :])
    packed['dw2'] = stack(lambda p: _pad_axis(p['dec_w2'], 2, C_PAD)).astype(jnp.bfloat16)
    packed['db2'] = stack(lambda p: _pad_axis(p['dec_b2'], 0, C_PAD)[None, :])
    cb = stack(lambda p: _pad_axis(p['codebook'], 0, K_PAD))          # (2, K_PAD, D) f32
    packed['cb'] = cb.astype(jnp.bfloat16)
    packed['cbt'] = jnp.swapaxes(cb, 1, 2).astype(jnp.bfloat16)       # (2, D, K_PAD)
    e2 = jnp.sum(cb * cb, axis=-1)                                    # (2, K_PAD)
    valid = (jnp.arange(K_PAD) < L_BINS)[None, :]
    packed['e2'] = jnp.where(valid, e2, 1e30)[:, None, :]             # (2, 1, K_PAD)
    return packed


# --------------------------------------------------------------------------
# JAX wrapper: one pallas_call for both halves & all batches, losses in XLA
# --------------------------------------------------------------------------

def _spec_hb(shape):
    """Arrays indexed by (half, batch): first two dims squeezed out."""
    n = len(shape)
    return pl.BlockSpec((None, None) + tuple(shape[2:]),
                        lambda h, b, _n=n: (h, b) + (0,) * (_n - 2))


def _spec_h(shape):
    """Per-half params: constant across the batch axis -> stay VMEM-resident."""
    n = len(shape)
    return pl.BlockSpec((None,) + tuple(shape[1:]),
                        lambda h, b, _n=n: (h,) + (0,) * (_n - 1))


def _vqvae_pair_forward(x_up, x_down, packed):
    B, T, _ = x_up.shape
    assert T % 2 == 0, "sequence length must be even (stride-2 encoder)"
    t_out = T // 2
    tp2 = t_out + 1

    def phases(x):
        # time pad by 1 each side, channel pad to C_PAD, split even/odd phases
        xp = jnp.pad(x, ((0, 0), (1, 1), (0, C_PAD - x.shape[-1])))
        xp = xp.astype(jnp.bfloat16)
        return xp[:, 0::2, :], xp[:, 1::2, :]

    uev, uod = phases(x_up)
    dev, dod = phases(x_down)
    x_ev = jnp.stack([uev, dev], axis=0)            # (2, B, tp2, C_PAD)
    x_od = jnp.stack([uod, dod], axis=0)

    data_ins = [x_ev, x_od]
    param_ins = [packed['ew1'], packed['eb1'], packed['ew2'], packed['eb2'],
                 packed['dw1'], packed['db1'], packed['dw2'], packed['db2'],
                 packed['cb'], packed['cbt'], packed['e2']]
    in_specs = ([_spec_hb(a.shape) for a in data_ins]
                + [_spec_h(a.shape) for a in param_ins])

    xout_shape = (2, B, 2, t_out, C_PAD)            # (half, batch, phase, T/2, C)
    commit_shape = (2, B, 1, K_PAD)
    out_shape = (jax.ShapeDtypeStruct(xout_shape, jnp.float32),
                 jax.ShapeDtypeStruct(commit_shape, jnp.float32))
    out_specs = (_spec_hb(xout_shape), _spec_hb(commit_shape))

    kernel = functools.partial(_fused_vqvae_kernel, t_out=t_out)
    xout_ph, commit = pl.pallas_call(
        kernel,
        grid=(2, B),                                 # half axis outermost
        in_specs=in_specs,
        out_specs=out_specs,
        out_shape=out_shape,
        compiler_params=pltpu.CompilerParams(
            dimension_semantics=("parallel", "parallel")),
    )(*data_ins, *param_ins)

    # interleave even/odd phases back to time-major (2, B, T, C_PAD)
    x_out = jnp.transpose(xout_ph, (0, 1, 3, 2, 4)).reshape(2, B, T, C_PAD)
    # per-half commit loss = mean over equal-sized per-batch means
    commit_half = jnp.mean(commit[:, :, 0, 0], axis=1)
    return x_out, commit_half


def _vqvae_losses(x, x_out_padded, commit, c_real):
    x_out = x_out_padded[..., :c_real]
    recons = jnp.mean((x - x_out) ** 2)
    vel = jnp.mean((jnp.diff(x, axis=1) - jnp.diff(x_out, axis=1)) ** 2)
    acc = jnp.mean((jnp.diff(x, n=2, axis=1) - jnp.diff(x_out, n=2, axis=1)) ** 2)
    loss = recons + COMMIT_W * commit + VEL_W * vel + ACC_W * acc
    metrics = {'recons_loss': recons, 'commit_loss': commit,
               'velocity_loss': vel, 'acceleration_loss': acc}
    return x_out, loss, metrics


def sep_vqvaer_forward(x, packed, phase='motion vqvae'):
    b, t, c = x.shape
    ch = JOINT_CHANNEL
    xj = x.reshape(b, t, c // ch, ch)
    xup = xj[:, :, SMPL_UP, :].reshape(b, t, -1)
    xdown = xj[:, :, SMPL_DOWN, :].reshape(b, t, -1)

    # Both halves and all batches in ONE fused Pallas kernel.
    x_out_all, commit = _vqvae_pair_forward(xup, xdown, packed)
    x_out_up, loss_up, metrics_up = _vqvae_losses(
        xup, x_out_all[0], commit[0], xup.shape[-1])
    # TODO(synk): VQVAER's root-translation (down) branch is not in the given
    # source; treated the same as VQVAE here (phase only gates the outputs).
    x_out_down, loss_down, metrics_down = _vqvae_losses(
        xdown, x_out_all[1], commit[1], xdown.shape[-1])

    cup = x_out_up.shape[-1]
    cdown = x_out_down.shape[-1]
    xout = jnp.zeros((b, t, (cup + cdown) // ch, ch), jnp.float32)
    xout = xout.at[:, :, SMPL_UP].set(x_out_up.reshape(b, t, cup // ch, ch))
    xout = xout.at[:, :, SMPL_DOWN].set(x_out_down.reshape(b, t, cdown // ch, ch))

    if phase == 'motion vqvae':
        return xout.reshape(b, t, -1), 0.5 * (loss_down + loss_up), None
    else:
        metrics_up = dict(metrics_up)
        metrics_up['acceleration_loss'] = metrics_up['acceleration_loss'] * 0
        metrics_up['velocity_loss'] = metrics_up['velocity_loss'] * 0
        return xout.reshape(b, t, -1), loss_down, [metrics_up, metrics_down]


if __name__ == "__main__":
    key = jax.random.PRNGKey(0)
    k_x, k_up, k_down = jax.random.split(key, 3)

    b, t = 2, 8
    c = 24 * JOINT_CHANNEL          # 24 SMPL joints x joint_channel
    x = jax.random.normal(k_x, (b, t, c), jnp.float32)

    params_up = init_vqvae_params(k_up, int(SMPL_UP.shape[0]) * JOINT_CHANNEL)
    params_down = init_vqvae_params(k_down, int(SMPL_DOWN.shape[0]) * JOINT_CHANNEL)
    packed = pack_params(params_up, params_down)

    fwd = jax.jit(sep_vqvaer_forward, static_argnames=('phase',))
    xout, loss, metrics = fwd(x, packed, phase='motion vqvae')
    jax.block_until_ready((xout, loss))
    assert xout.shape == (b, t, c)
    assert metrics is None
    print("KERNEL_OK")
</pallas_src>

<mosaic_0001>
module attributes {stable_mosaic.version = 11 : i64} {
  func.func @_fused_vqvae_kernel(%arg0: i32, %arg1: i32, %arg2: memref<1x1x5x128xbf16, #tpu.memory_space<vmem>>, %arg3: memref<1x1x5x128xbf16, #tpu.memory_space<vmem>>, %arg4: memref<1x4x128x32xbf16, #tpu.memory_space<vmem>>, %arg5: memref<1x1x32xf32, #tpu.memory_space<vmem>>, %arg6: memref<1x3x32x32xbf16, #tpu.memory_space<vmem>>, %arg7: memref<1x1x32xf32, #tpu.memory_space<vmem>>, %arg8: memref<1x3x32x32xbf16, #tpu.memory_space<vmem>>, %arg9: memref<1x1x32xf32, #tpu.memory_space<vmem>>, %arg10: memref<1x4x32x128xbf16, #tpu.memory_space<vmem>>, %arg11: memref<1x1x128xf32, #tpu.memory_space<vmem>>, %arg12: memref<1x128x32xbf16, #tpu.memory_space<vmem>>, %arg13: memref<1x32x128xbf16, #tpu.memory_space<vmem>>, %arg14: memref<1x1x128xf32, #tpu.memory_space<vmem>>, %arg15: memref<1x1x2x4x128xf32, #tpu.memory_space<vmem>>, %arg16: memref<1x1x1x128xf32, #tpu.memory_space<vmem>>) attributes {dimension_semantics = [#tpu.dimension_semantics<parallel>, #tpu.dimension_semantics<parallel>], iteration_bounds = array<i64: 2, 2>, scalar_prefetch = 0 : i64, scratch_operands = 0 : i64, tpu.core_type = #tpu.core_type<tc>, window_params = [{transform_indices = @transform_0, window_bounds = array<i64: 1, 1, 5, 128>}, {transform_indices = @transform_1, window_bounds = array<i64: 1, 1, 5, 128>}, {transform_indices = @transform_2, window_bounds = array<i64: 1, 4, 128, 32>}, {transform_indices = @transform_3, window_bounds = array<i64: 1, 1, 32>}, {transform_indices = @transform_4, window_bounds = array<i64: 1, 3, 32, 32>}, {transform_indices = @transform_5, window_bounds = array<i64: 1, 1, 32>}, {transform_indices = @transform_6, window_bounds = array<i64: 1, 3, 32, 32>}, {transform_indices = @transform_7, window_bounds = array<i64: 1, 1, 32>}, {transform_indices = @transform_8, window_bounds = array<i64: 1, 4, 32, 128>}, {transform_indices = @transform_9, window_bounds = array<i64: 1, 1, 128>}, {transform_indices = @transform_10, window_bounds = array<i64: 1, 128, 32>}, {transform_indices = @transform_11, window_bounds = array<i64: 1, 32, 128>}, {transform_indices = @transform_12, window_bounds = array<i64: 1, 1, 128>}, {transform_indices = @transform_13, window_bounds = array<i64: 1, 1, 2, 4, 128>}, {transform_indices = @transform_14, window_bounds = array<i64: 1, 1, 1, 128>}]} {
    %c0 = arith.constant 0 : index
    %c0_0 = arith.constant 0 : index
    %c0_1 = arith.constant 0 : index
    %c0_2 = arith.constant 0 : index
    %0 = vector.load %arg2[%c0, %c0_0, %c0_1, %c0_2] : memref<1x1x5x128xbf16, #tpu.memory_space<vmem>>, vector<1x1x5x128xbf16>
    %1 = vector.shape_cast %0 : vector<1x1x5x128xbf16> to vector<5x128xbf16>
    %c0_3 = arith.constant 0 : index
    %c0_4 = arith.constant 0 : index
    %c0_5 = arith.constant 0 : index
    %c0_6 = arith.constant 0 : index
    %2 = vector.load %arg3[%c0_3, %c0_4, %c0_5, %c0_6] : memref<1x1x5x128xbf16, #tpu.memory_space<vmem>>, vector<1x1x5x128xbf16>
    %3 = vector.shape_cast %2 : vector<1x1x5x128xbf16> to vector<5x128xbf16>
    %c0_7 = arith.constant 0 : index
    %c0_8 = arith.constant 0 : index
    %c0_9 = arith.constant 0 : index
    %4 = vector.load %arg5[%c0_7, %c0_8, %c0_9] : memref<1x1x32xf32, #tpu.memory_space<vmem>>, vector<1x1x32xf32>
    %5 = vector.shape_cast %4 : vector<1x1x32xf32> to vector<1x32xf32>
    %6 = vector.extract_strided_slice %1 {offsets = [0, 0], sizes = [4, 128], strides = [1, 1]} : vector<5x128xbf16> to vector<4x128xbf16>
    %c0_10 = arith.constant 0 : index
    %c0_11 = arith.constant 0 : index
    %c0_12 = arith.constant 0 : index
    %c0_13 = arith.constant 0 : index
    %7 = vector.load %arg4[%c0_10, %c0_11, %c0_12, %c0_13] : memref<1x4x128x32xbf16, #tpu.memory_space<vmem>>, vector<1x1x128x32xbf16>
    %8 = vector.shape_cast %7 : vector<1x1x128x32xbf16> to vector<128x32xbf16>
    %cst = arith.constant dense<0.000000e+00> : vector<4x32xf32>
    %9 = tpu.matmul %6, %8, %cst {dimension_numbers = #tpu.dot_dimension_numbers<[1], [0], [0], [1], [0, 0, 1, 1], [], []>} : vector<4x128xbf16>, vector<128x32xbf16>, vector<4x32xf32> -> vector<4x32xf32>
    %10 = vector.broadcast %5 : vector<1x32xf32> to vector<4x32xf32>
    %11 = arith.addf %10, %9 : vector<4x32xf32>
    %12 = vector.extract_strided_slice %3 {offsets = [0, 0], sizes = [4, 128], strides = [1, 1]} : vector<5x128xbf16> to vector<4x128xbf16>
    %c0_14 = arith.constant 0 : index
    %c1 = arith.constant 1 : index
    %c0_15 = arith.constant 0 : index
    %c0_16 = arith.constant 0 : index
    %13 = vector.load %arg4[%c0_14, %c1, %c0_15, %c0_16] : memref<1x4x128x32xbf16, #tpu.memory_space<vmem>>, vector<1x1x128x32xbf16>
    %14 = vector.shape_cast %13 : vector<1x1x128x32xbf16> to vector<128x32xbf16>
    %cst_17 = arith.constant dense<0.000000e+00> : vector<4x32xf32>
    %15 = tpu.matmul %12, %14, %cst_17 {dimension_numbers = #tpu.dot_dimension_numbers<[1], [0], [0], [1], [0, 0, 1, 1], [], []>} : vector<4x128xbf16>, vector<128x32xbf16>, vector<4x32xf32> -> vector<4x32xf32>
    %16 = arith.addf %11, %15 : vector<4x32xf32>
    %17 = vector.extract_strided_slice %1 {offsets = [1, 0], sizes = [4, 128], strides = [1, 1]} : vector<5x128xbf16> to vector<4x128xbf16>
    %c0_18 = arith.constant 0 : index
    %c2 = arith.constant 2 : index
    %c0_19 = arith.constant 0 : index
    %c0_20 = arith.constant 0 : index
    %18 = vector.load %arg4[%c0_18, %c2, %c0_19, %c0_20] : memref<1x4x128x32xbf16, #tpu.memory_space<vmem>>, vector<1x1x128x32xbf16>
    %19 = vector.shape_cast %18 : vector<1x1x128x32xbf16> to vector<128x32xbf16>
    %cst_21 = arith.constant dense<0.000000e+00> : vector<4x32xf32>
    %20 = tpu.matmul %17, %19, %cst_21 {dimension_numbers = #tpu.dot_dimension_numbers<[1], [0], [0], [1], [0, 0, 1, 1], [], []>} : vector<4x128xbf16>, vector<128x32xbf16>, vector<4x32xf32> -> vector<4x32xf32>
    %21 = arith.addf %16, %20 : vector<4x32xf32>
    %22 = vector.extract_strided_slice %3 {offsets = [1, 0], sizes = [4, 128], strides = [1, 1]} : vector<5x128xbf16> to vector<4x128xbf16>
    %c0_22 = arith.constant 0 : index
    %c3 = arith.constant 3 : index
    %c0_23 = arith.constant 0 : index
    %c0_24 = arith.constant 0 : index
    %23 = vector.load %arg4[%c0_22, %c3, %c0_23, %c0_24] : memref<1x4x128x32xbf16, #tpu.memory_space<vmem>>, vector<1x1x128x32xbf16>
    %24 = vector.shape_cast %23 : vector<1x1x128x32xbf16> to vector<128x32xbf16>
    %cst_25 = arith.constant dense<0.000000e+00> : vector<4x32xf32>
    %25 = tpu.matmul %22, %24, %cst_25 {dimension_numbers = #tpu.dot_dimension_numbers<[1], [0], [0], [1], [0, 0, 1, 1], [], []>} : vector<4x128xbf16>, vector<128x32xbf16>, vector<4x32xf32> -> vector<4x32xf32>
    %26 = arith.addf %21, %25 : vector<4x32xf32>
    %cst_26 = arith.constant 0.000000e+00 : f32
    %27 = vector.broadcast %cst_26 : f32 to vector<4x32xf32>
    %28 = arith.maximumf %26, %27 : vector<4x32xf32>
    %29 = arith.truncf %28 : vector<4x32xf32> to vector<4x32xbf16>
    %c0_27 = arith.constant 0 : index
    %c0_28 = arith.constant 0 : index
    %c0_29 = arith.constant 0 : index
    %30 = vector.load %arg7[%c0_27, %c0_28, %c0_29] : memref<1x1x32xf32, #tpu.memory_space<vmem>>, vector<1x1x32xf32>
    %31 = vector.shape_cast %30 : vector<1x1x32xf32> to vector<1x32xf32>
    %cst_30 = arith.constant 0.000000e+00 : bf16
    %32 = vector.broadcast %cst_30 : bf16 to vector<1x32xbf16>
    %33 = vector.extract_strided_slice %29 {offsets = [0, 0], sizes = [3, 32], strides = [1, 1]} : vector<4x32xbf16> to vector<3x32xbf16>
    %34 = tpu.concatenate %32, %33 in 0 : vector<1x32xbf16>, vector<3x32xbf16> -> vector<4x32xbf16>
    %c0_31 = arith.constant 0 : index
    %c0_32 = arith.constant 0 : index
    %c0_33 = arith.constant 0 : index
    %c0_34 = arith.constant 0 : index
    %35 = vector.load %arg6[%c0_31, %c0_32, %c0_33, %c0_34] : memref<1x3x32x32xbf16, #tpu.memory_space<vmem>>, vector<1x1x32x32xbf16>
    %36 = vector.shape_cast %35 : vector<1x1x32x32xbf16> to vector<32x32xbf16>
    %cst_35 = arith.constant dense<0.000000e+00> : vector<4x32xf32>
    %37 = tpu.matmul %34, %36, %cst_35 {dimension_numbers = #tpu.dot_dimension_numbers<[1], [0], [0], [1], [0, 0, 1, 1], [], []>} : vector<4x32xbf16>, vector<32x32xbf16>, vector<4x32xf32> -> vector<4x32xf32>
    %38 = vector.broadcast %31 : vector<1x32xf32> to vector<4x32xf32>
    %39 = arith.addf %38, %37 : vector<4x32xf32>
    %c0_36 = arith.constant 0 : index
    %c1_37 = arith.constant 1 : index
    %c0_38 = arith.constant 0 : index
    %c0_39 = arith.constant 0 : index
    %40 = vector.load %arg6[%c0_36, %c1_37, %c0_38, %c0_39] : memref<1x3x32x32xbf16, #tpu.memory_space<vmem>>, vector<1x1x32x32xbf16>
    %41 = vector.shape_cast %40 : vector<1x1x32x32xbf16> to vector<32x32xbf16>
    %cst_40 = arith.constant dense<0.000000e+00> : vector<4x32xf32>
    %42 = tpu.matmul %29, %41, %cst_40 {dimension_numbers = #tpu.dot_dimension_numbers<[1], [0], [0], [1], [0, 0, 1, 1], [], []>} : vector<4x32xbf16>, vector<32x32xbf16>, vector<4x32xf32> -> vector<4x32xf32>
    %43 = arith.addf %39, %42 : vector<4x32xf32>
    %cst_41 = arith.constant 0.000000e+00 : bf16
    %44 = vector.broadcast %cst_41 : bf16 to vector<1x32xbf16>
    %45 = vector.extract_strided_slice %29 {offsets = [1, 0], sizes = [3, 32], strides = [1, 1]} : vector<4x32xbf16> to vector<3x32xbf16>
    %46 = tpu.concatenate %45, %44 in 0 : vector<3x32xbf16>, vector<1x32xbf16> -> vector<4x32xbf16>
    %c0_42 = arith.constant 0 : index
    %c2_43 = arith.constant 2 : index
    %c0_44 = arith.constant 0 : index
    %c0_45 = arith.constant 0 : index
    %47 = vector.load %arg6[%c0_42, %c2_43, %c0_44, %c0_45] : memref<1x3x32x32xbf16, #tpu.memory_space<vmem>>, vector<1x1x32x32xbf16>
    %48 = vector.shape_cast %47 : vector<1x1x32x32xbf16> to vector<32x32xbf16>
    %cst_46 = arith.constant dense<0.000000e+00> : vector<4x32xf32>
    %49 = tpu.matmul %46, %48, %cst_46 {dimension_numbers = #tpu.dot_dimension_numbers<[1], [0], [0], [1], [0, 0, 1, 1], [], []>} : vector<4x32xbf16>, vector<32x32xbf16>, vector<4x32xf32> -> vector<4x32xf32>
    %50 = arith.addf %43, %49 : vector<4x32xf32>
    %c0_47 = arith.constant 0 : index
    %c0_48 = arith.constant 0 : index
    %c0_49 = arith.constant 0 : index
    %51 = vector.load %arg13[%c0_47, %c0_48, %c0_49] : memref<1x32x128xbf16, #tpu.memory_space<vmem>>, vector<1x32x128xbf16>
    %52 = vector.shape_cast %51 : vector<1x32x128xbf16> to vector<32x128xbf16>
    %53 = arith.truncf %50 : vector<4x32xf32> to vector<4x32xbf16>
    %cst_50 = arith.constant dense<0.000000e+00> : vector<4x128xf32>
    %54 = tpu.matmul %53, %52, %cst_50 {dimension_numbers = #tpu.dot_dimension_numbers<[1], [0], [0], [1], [0, 0, 1, 1], [], []>} : vector<4x32xbf16>, vector<32x128xbf16>, vector<4x128xf32> -> vector<4x128xf32>
    %c0_51 = arith.constant 0 : index
    %c0_52 = arith.constant 0 : index
    %c0_53 = arith.constant 0 : index
    %55 = vector.load %arg14[%c0_51, %c0_52, %c0_53] : memref<1x1x128xf32, #tpu.memory_space<vmem>>, vector<1x1x128xf32>
    %56 = vector.shape_cast %55 : vector<1x1x128xf32> to vector<1x128xf32>
    %cst_54 = arith.constant 2.000000e+00 : f32
    %57 = vector.broadcast %cst_54 : f32 to vector<4x128xf32>
    %58 = arith.mulf %57, %54 : vector<4x128xf32>
    %59 = vector.broadcast %56 : vector<1x128xf32> to vector<4x128xf32>
    %60 = arith.subf %59, %58 : vector<4x128xf32>
    %cst_55 = arith.constant dense<0x7F800000> : vector<4xf32>
    %61 = vector.multi_reduction <minimumf>, %60, %cst_55 [1] : vector<4x128xf32> to vector<4xf32>
    %62 = vector.shape_cast %61 : vector<4xf32> to vector<4x1xf32>
    %63 = tpu.iota {dimensions = array<i32: 1>} : vector<4x128xi32>
    %64 = vector.broadcast %62 : vector<4x1xf32> to vector<4x128xf32>
    %65 = arith.cmpf ole, %60, %64 : vector<4x128xf32>
    %c128_i32 = arith.constant 128 : i32
    %66 = vector.broadcast %c128_i32 : i32 to vector<4x128xi32>
    %67 = arith.select %65, %63, %66 : vector<4x128xi1>, vector<4x128xi32>
    %cst_56 = arith.constant dense<2147483647> : vector<4xi32>
    %68 = vector.multi_reduction <minsi>, %67, %cst_56 [1] : vector<4x128xi32> to vector<4xi32>
    %69 = vector.shape_cast %68 : vector<4xi32> to vector<4x1xi32>
    %70 = vector.broadcast %69 : vector<4x1xi32> to vector<4x128xi32>
    %71 = arith.cmpi eq, %63, %70 : vector<4x128xi32>
    %72 = arith.extui %71 : vector<4x128xi1> to vector<4x128xi32>
    %73 = arith.sitofp %72 : vector<4x128xi32> to vector<4x128xf32>
    %74 = arith.truncf %73 : vector<4x128xf32> to vector<4x128xbf16>
    %c0_57 = arith.constant 0 : index
    %c0_58 = arith.constant 0 : index
    %c0_59 = arith.constant 0 : index
    %75 = vector.load %arg12[%c0_57, %c0_58, %c0_59] : memref<1x128x32xbf16, #tpu.memory_space<vmem>>, vector<1x128x32xbf16>
    %76 = vector.shape_cast %75 : vector<1x128x32xbf16> to vector<128x32xbf16>
    %cst_60 = arith.constant dense<0.000000e+00> : vector<4x32xf32>
    %77 = tpu.matmul %74, %76, %cst_60 {dimension_numbers = #tpu.dot_dimension_numbers<[1], [0], [0], [1], [0, 0, 1, 1], [], []>} : vector<4x128xbf16>, vector<128x32xbf16>, vector<4x32xf32> -> vector<4x32xf32>
    %78 = arith.subf %50, %77 : vector<4x32xf32>
    %79 = arith.mulf %78, %78 : vector<4x32xf32>
    %80 = vector.shape_cast %79 : vector<4x32xf32> to vector<1x4x32xf32>
    %cst_61 = arith.constant dense<0.000000e+00> : vector<1xf32>
    %81 = vector.multi_reduction <add>, %80, %cst_61 [1, 2] : vector<1x4x32xf32> to vector<1xf32>
    %82 = vector.shape_cast %81 : vector<1xf32> to vector<1x1x1xf32>
    %83 = vector.extract %82[0, 0, 0] : f32 from vector<1x1x1xf32>
    %cst_62 = arith.constant 1.280000e+02 : f32
    %84 = arith.divf %83, %cst_62 : f32
    %85 = arith.truncf %77 : vector<4x32xf32> to vector<4x32xbf16>
    %c0_63 = arith.constant 0 : index
    %c0_64 = arith.constant 0 : index
    %c0_65 = arith.constant 0 : index
    %86 = vector.load %arg9[%c0_63, %c0_64, %c0_65] : memref<1x1x32xf32, #tpu.memory_space<vmem>>, vector<1x1x32xf32>
    %87 = vector.shape_cast %86 : vector<1x1x32xf32> to vector<1x32xf32>
    %cst_66 = arith.constant 0.000000e+00 : bf16
    %88 = vector.broadcast %cst_66 : bf16 to vector<1x32xbf16>
    %89 = vector.extract_strided_slice %85 {offsets = [0, 0], sizes = [3, 32], strides = [1, 1]} : vector<4x32xbf16> to vector<3x32xbf16>
    %90 = tpu.concatenate %88, %89 in 0 : vector<1x32xbf16>, vector<3x32xbf16> -> vector<4x32xbf16>
    %c0_67 = arith.constant 0 : index
    %c0_68 = arith.constant 0 : index
    %c0_69 = arith.constant 0 : index
    %c0_70 = arith.constant 0 : index
    %91 = vector.load %arg8[%c0_67, %c0_68, %c0_69, %c0_70] : memref<1x3x32x32xbf16, #tpu.memory_space<vmem>>, vector<1x1x32x32xbf16>
    %92 = vector.shape_cast %91 : vector<1x1x32x32xbf16> to vector<32x32xbf16>
    %cst_71 = arith.constant dense<0.000000e+00> : vector<4x32xf32>
    %93 = tpu.matmul %90, %92, %cst_71 {dimension_numbers = #tpu.dot_dimension_numbers<[1], [0], [0], [1], [0, 0, 1, 1], [], []>} : vector<4x32xbf16>, vector<32x32xbf16>, vector<4x32xf32> -> vector<4x32xf32>
    %94 = vector.broadcast %87 : vector<1x32xf32> to vector<4x32xf32>
    %95 = arith.addf %94, %93 : vector<4x32xf32>
    %c0_72 = arith.constant 0 : index
    %c1_73 = arith.constant 1 : index
    %c0_74 = arith.constant 0 : index
    %c0_75 = arith.constant 0 : index
    %96 = vector.load %arg8[%c0_72, %c1_73, %c0_74, %c0_75] : memref<1x3x32x32xbf16, #tpu.memory_space<vmem>>, vector<1x1x32x32xbf16>
    %97 = vector.shape_cast %96 : vector<1x1x32x32xbf16> to vector<32x32xbf16>
    %cst_76 = arith.constant dense<0.000000e+00> : vector<4x32xf32>
    %98 = tpu.matmul %85, %97, %cst_76 {dimension_numbers = #tpu.dot_dimension_numbers<[1], [0], [0], [1], [0, 0, 1, 1], [], []>} : vector<4x32xbf16>, vector<32x32xbf16>, vector<4x32xf32> -> vector<4x32xf32>
    %99 = arith.addf %95, %98 : vector<4x32xf32>
    %cst_77 = arith.constant 0.000000e+00 : bf16
    %100 = vector.broadcast %cst_77 : bf16 to vector<1x32xbf16>
    %101 = vector.extract_strided_slice %85 {offsets = [1, 0], sizes = [3, 32], strides = [1, 1]} : vector<4x32xbf16> to vector<3x32xbf16>
    %102 = tpu.concatenate %101, %100 in 0 : vector<3x32xbf16>, vector<1x32xbf16> -> vector<4x32xbf16>
    %c0_78 = arith.constant 0 : index
    %c2_79 = arith.constant 2 : index
    %c0_80 = arith.constant 0 : index
    %c0_81 = arith.constant 0 : index
    %103 = vector.load %arg8[%c0_78, %c2_79, %c0_80, %c0_81] : memref<1x3x32x32xbf16, #tpu.memory_space<vmem>>, vector<1x1x32x32xbf16>
    %104 = vector.shape_cast %103 : vector<1x1x32x32xbf16> to vector<32x32xbf16>
    %cst_82 = arith.constant dense<0.000000e+00> : vector<4x32xf32>
    %105 = tpu.matmul %102, %104, %cst_82 {dimension_numbers = #tpu.dot_dimension_numbers<[1], [0], [0], [1], [0, 0, 1, 1], [], []>} : vector<4x32xbf16>, vector<32x32xbf16>, vector<4x32xf32> -> vector<4x32xf32>
    %106 = arith.addf %99, %105 : vector<4x32xf32>
    %cst_83 = arith.constant 0.000000e+00 : f32
    %107 = vector.broadcast %cst_83 : f32 to vector<4x32xf32>
    %108 = arith.maximumf %106, %107 : vector<4x32xf32>
    %109 = arith.truncf %108 : vector<4x32xf32> to vector<4x32xbf16>
    %c0_84 = arith.constant 0 : index
    %c0_85 = arith.constant 0 : index
    %c0_86 = arith.constant 0 : index
    %110 = vector.load %arg11[%c0_84, %c0_85, %c0_86] : memref<1x1x128xf32, #tpu.memory_space<vmem>>, vector<1x1x128xf32>
    %111 = vector.shape_cast %110 : vector<1x1x128xf32> to vector<1x128xf32>
    %c0_87 = arith.constant 0 : index
    %c1_88 = arith.constant 1 : index
    %c0_89 = arith.constant 0 : index
    %c0_90 = arith.constant 0 : index
    %112 = vector.load %arg10[%c0_87, %c1_88, %c0_89, %c0_90] : memref<1x4x32x128xbf16, #tpu.memory_space<vmem>>, vector<1x1x32x128xbf16>
    %113 = vector.shape_cast %112 : vector<1x1x32x128xbf16> to vector<32x128xbf16>
    %cst_91 = arith.constant dense<0.000000e+00> : vector<4x128xf32>
    %114 = tpu.matmul %109, %113, %cst_91 {dimension_numbers = #tpu.dot_dimension_numbers<[1], [0], [0], [1], [0, 0, 1, 1], [], []>} : vector<4x32xbf16>, vector<32x128xbf16>, vector<4x128xf32> -> vector<4x128xf32>
    %115 = vector.broadcast %111 : vector<1x128xf32> to vector<4x128xf32>
    %116 = arith.addf %115, %114 : vector<4x128xf32>
    %cst_92 = arith.constant 0.000000e+00 : bf16
    %117 = vector.broadcast %cst_92 : bf16 to vector<1x32xbf16>
    %118 = vector.extract_strided_slice %109 {offsets = [0, 0], sizes = [3, 32], strides = [1, 1]} : vector<4x32xbf16> to vector<3x32xbf16>
    %119 = tpu.concatenate %117, %118 in 0 : vector<1x32xbf16>, vector<3x32xbf16> -> vector<4x32xbf16>
    %c0_93 = arith.constant 0 : index
    %c3_94 = arith.constant 3 : index
    %c0_95 = arith.constant 0 : index
    %c0_96 = arith.constant 0 : index
    %120 = vector.load %arg10[%c0_93, %c3_94, %c0_95, %c0_96] : memref<1x4x32x128xbf16, #tpu.memory_space<vmem>>, vector<1x1x32x128xbf16>
    %121 = vector.shape_cast %120 : vector<1x1x32x128xbf16> to vector<32x128xbf16>
    %cst_97 = arith.constant dense<0.000000e+00> : vector<4x128xf32>
    %122 = tpu.matmul %119, %121, %cst_97 {dimension_numbers = #tpu.dot_dimension_numbers<[1], [0], [0], [1], [0, 0, 1, 1], [], []>} : vector<4x32xbf16>, vector<32x128xbf16>, vector<4x128xf32> -> vector<4x128xf32>
    %123 = arith.addf %116, %122 : vector<4x128xf32>
    %c0_98 = arith.constant 0 : index
    %c2_99 = arith.constant 2 : index
    %c0_100 = arith.constant 0 : index
    %c0_101 = arith.constant 0 : index
    %124 = vector.load %arg10[%c0_98, %c2_99, %c0_100, %c0_101] : memref<1x4x32x128xbf16, #tpu.memory_space<vmem>>, vector<1x1x32x128xbf16>
    %125 = vector.shape_cast %124 : vector<1x1x32x128xbf16> to vector<32x128xbf16>
    %cst_102 = arith.constant dense<0.000000e+00> : vector<4x128xf32>
    %126 = tpu.matmul %109, %125, %cst_102 {dimension_numbers = #tpu.dot_dimension_numbers<[1], [0], [0], [1], [0, 0, 1, 1], [], []>} : vector<4x32xbf16>, vector<32x128xbf16>, vector<4x128xf32> -> vector<4x128xf32>
    %127 = vector.broadcast %111 : vector<1x128xf32> to vector<4x128xf32>
    %128 = arith.addf %127, %126 : vector<4x128xf32>
    %cst_103 = arith.constant 0.000000e+00 : bf16
    %129 = vector.broadcast %cst_103 : bf16 to vector<1x32xbf16>
    %130 = vector.extract_strided_slice %109 {offsets = [1, 0], sizes = [3, 32], strides = [1, 1]} : vector<4x32xbf16> to vector<3x32xbf16>
    %131 = tpu.concatenate %130, %129 in 0 : vector<3x32xbf16>, vector<1x32xbf16> -> vector<4x32xbf16>
    %c0_104 = arith.constant 0 : index
    %c0_105 = arith.constant 0 : index
    %c0_106 = arith.constant 0 : index
    %c0_107 = arith.constant 0 : index
    %132 = vector.load %arg10[%c0_104, %c0_105, %c0_106, %c0_107] : memref<1x4x32x128xbf16, #tpu.memory_space<vmem>>, vector<1x1x32x128xbf16>
    %133 = vector.shape_cast %132 : vector<1x1x32x128xbf16> to vector<32x128xbf16>
    %cst_108 = arith.constant dense<0.000000e+00> : vector<4x128xf32>
    %134 = tpu.matmul %131, %133, %cst_108 {dimension_numbers = #tpu.dot_dimension_numbers<[1], [0], [0], [1], [0, 0, 1, 1], [], []>} : vector<4x32xbf16>, vector<32x128xbf16>, vector<4x128xf32> -> vector<4x128xf32>
    %135 = arith.addf %128, %134 : vector<4x128xf32>
    %c0_109 = arith.constant 0 : index
    %c0_110 = arith.constant 0 : index
    %c0_111 = arith.constant 0 : index
    %c0_112 = arith.constant 0 : index
    %c0_113 = arith.constant 0 : index
    %136 = vector.load %arg15[%c0_109, %c0_110, %c0_111, %c0_112, %c0_113] : memref<1x1x2x4x128xf32, #tpu.memory_space<vmem>>, vector<1x1x1x4x128xf32>
    %137 = vector.shape_cast %136 : vector<1x1x1x4x128xf32> to vector<4x128xf32>
    %138 = vector.shape_cast %123 : vector<4x128xf32> to vector<1x1x1x4x128xf32>
    tpu.vector_store %arg15[%c0_109, %c0_110, %c0_111, %c0_112, %c0_113], %138 {strides = array<i32>} : memref<1x1x2x4x128xf32, #tpu.memory_space<vmem>>, vector<1x1x1x4x128xf32>,
    %c0_114 = arith.constant 0 : index
    %c0_115 = arith.constant 0 : index
    %c1_116 = arith.constant 1 : index
    %c0_117 = arith.constant 0 : index
    %c0_118 = arith.constant 0 : index
    %139 = vector.load %arg15[%c0_114, %c0_115, %c1_116, %c0_117, %c0_118] : memref<1x1x2x4x128xf32, #tpu.memory_space<vmem>>, vector<1x1x1x4x128xf32>
    %140 = vector.shape_cast %139 : vector<1x1x1x4x128xf32> to vector<4x128xf32>
    %141 = vector.shape_cast %135 : vector<4x128xf32> to vector<1x1x1x4x128xf32>
    tpu.vector_store %arg15[%c0_114, %c0_115, %c1_116, %c0_117, %c0_118], %141 {strides = array<i32>} : memref<1x1x2x4x128xf32, #tpu.memory_space<vmem>>, vector<1x1x1x4x128xf32>,
    %142 = vector.broadcast %84 : f32 to vector<1x128xf32>
    %c0_119 = arith.constant 0 : index
    %c0_120 = arith.constant 0 : index
    %c0_121 = arith.constant 0 : index
    %c0_122 = arith.constant 0 : index
    %143 = vector.load %arg16[%c0_119, %c0_120, %c0_121, %c0_122] : memref<1x1x1x128xf32, #tpu.memory_space<vmem>>, vector<1x1x1x128xf32>
    %144 = vector.shape_cast %143 : vector<1x1x1x128xf32> to vector<1x128xf32>
    %145 = vector.shape_cast %142 : vector<1x128xf32> to vector<1x1x1x128xf32>
    tpu.vector_store %arg16[%c0_119, %c0_120, %c0_121, %c0_122], %145 {strides = array<i32>} : memref<1x1x1x128xf32, #tpu.memory_space<vmem>>, vector<1x1x1x128xf32>,
    return
  }
  func.func @transform_0(%arg0: i32, %arg1: i32) -> (i32, i32, i32, i32) {
    %c0_i32 = arith.constant 0 : i32
    %c0_i32_0 = arith.constant 0 : i32
    %c0_i32_1 = arith.constant 0 : i32
    return %arg0, %arg1, %c0_i32, %c0_i32_0 : i32, i32, i32, i32
  }
  func.func @transform_1(%arg0: i32, %arg1: i32) -> (i32, i32, i32, i32) {
    %c0_i32 = arith.constant 0 : i32
    %c0_i32_0 = arith.constant 0 : i32
    %c0_i32_1 = arith.constant 0 : i32
    return %arg0, %arg1, %c0_i32, %c0_i32_0 : i32, i32, i32, i32
  }
  func.func @transform_2(%arg0: i32, %arg1: i32) -> (i32, i32, i32, i32) {
    %c0_i32 = arith.constant 0 : i32
    %c0_i32_0 = arith.constant 0 : i32
    %c0_i32_1 = arith.constant 0 : i32
    %c0_i32_2 = arith.constant 0 : i32
    return %arg0, %c0_i32, %c0_i32_0, %c0_i32_1 : i32, i32, i32, i32
  }
  func.func @transform_3(%arg0: i32, %arg1: i32) -> (i32, i32, i32) {
    %c0_i32 = arith.constant 0 : i32
    %c0_i32_0 = arith.constant 0 : i32
    %c0_i32_1 = arith.constant 0 : i32
    return %arg0, %c0_i32, %c0_i32_0 : i32, i32, i32
  }
  func.func @transform_4(%arg0: i32, %arg1: i32) -> (i32, i32, i32, i32) {
    %c0_i32 = arith.constant 0 : i32
    %c0_i32_0 = arith.constant 0 : i32
    %c0_i32_1 = arith.constant 0 : i32
    %c0_i32_2 = arith.constant 0 : i32
    return %arg0, %c0_i32, %c0_i32_0, %c0_i32_1 : i32, i32, i32, i32
  }
  func.func @transform_5(%arg0: i32, %arg1: i32) -> (i32, i32, i32) {
    %c0_i32 = arith.constant 0 : i32
    %c0_i32_0 = arith.constant 0 : i32
    %c0_i32_1 = arith.constant 0 : i32
    return %arg0, %c0_i32, %c0_i32_0 : i32, i32, i32
  }
  func.func @transform_6(%arg0: i32, %arg1: i32) -> (i32, i32, i32, i32) {
    %c0_i32 = arith.constant 0 : i32
    %c0_i32_0 = arith.constant 0 : i32
    %c0_i32_1 = arith.constant 0 : i32
    %c0_i32_2 = arith.constant 0 : i32
    return %arg0, %c0_i32, %c0_i32_0, %c0_i32_1 : i32, i32, i32, i32
  }
  func.func @transform_7(%arg0: i32, %arg1: i32) -> (i32, i32, i32) {
    %c0_i32 = arith.constant 0 : i32
    %c0_i32_0 = arith.constant 0 : i32
    %c0_i32_1 = arith.constant 0 : i32
    return %arg0, %c0_i32, %c0_i32_0 : i32, i32, i32
  }
  func.func @transform_8(%arg0: i32, %arg1: i32) -> (i32, i32, i32, i32) {
    %c0_i32 = arith.constant 0 : i32
    %c0_i32_0 = arith.constant 0 : i32
    %c0_i32_1 = arith.constant 0 : i32
    %c0_i32_2 = arith.constant 0 : i32
    return %arg0, %c0_i32, %c0_i32_0, %c0_i32_1 : i32, i32, i32, i32
  }
  func.func @transform_9(%arg0: i32, %arg1: i32) -> (i32, i32, i32) {
    %c0_i32 = arith.constant 0 : i32
    %c0_i32_0 = arith.constant 0 : i32
    %c0_i32_1 = arith.constant 0 : i32
    return %arg0, %c0_i32, %c0_i32_0 : i32, i32, i32
  }
  func.func @transform_10(%arg0: i32, %arg1: i32) -> (i32, i32, i32) {
    %c0_i32 = arith.constant 0 : i32
    %c0_i32_0 = arith.constant 0 : i32
    %c0_i32_1 = arith.constant 0 : i32
    return %arg0, %c0_i32, %c0_i32_0 : i32, i32, i32
  }
  func.func @transform_11(%arg0: i32, %arg1: i32) -> (i32, i32, i32) {
    %c0_i32 = arith.constant 0 : i32
    %c0_i32_0 = arith.constant 0 : i32
    %c0_i32_1 = arith.constant 0 : i32
    return %arg0, %c0_i32, %c0_i32_0 : i32, i32, i32
  }
  func.func @transform_12(%arg0: i32, %arg1: i32) -> (i32, i32, i32) {
    %c0_i32 = arith.constant 0 : i32
    %c0_i32_0 = arith.constant 0 : i32
    %c0_i32_1 = arith.constant 0 : i32
    return %arg0, %c0_i32, %c0_i32_0 : i32, i32, i32
  }
  func.func @transform_13(%arg0: i32, %arg1: i32) -> (i32, i32, i32, i32, i32) {
    %c0_i32 = arith.constant 0 : i32
    %c0_i32_0 = arith.constant 0 : i32
    %c0_i32_1 = arith.constant 0 : i32
    %c0_i32_2 = arith.constant 0 : i32
    return %arg0, %arg1, %c0_i32, %c0_i32_0, %c0_i32_1 : i32, i32, i32, i32, i32
  }
  func.func @transform_14(%arg0: i32, %arg1: i32) -> (i32, i32, i32, i32) {
    %c0_i32 = arith.constant 0 : i32
    %c0_i32_0 = arith.constant 0 : i32
    %c0_i32_1 = arith.constant 0 : i32
    return %arg0, %arg1, %c0_i32, %c0_i32_0 : i32, i32, i32, i32
  }
}

</mosaic_0001>

<bundles_post_ra>
// kernel: sep_vqvaer_forward.1
= control target key start
LH: loop header
LB: loop body
LE: loop exit
PB: predicated region body
PF: predicated region fallthrough
CT: control target
= control target key end

     0   :  { %s3041_s29 = smov 0   ;;  %s3043_s30 = smov 0   ;;  %s3354_s0 = inlined_call_operand.vmem [shape: bf16[2,2,5,128], index: 0, kind: input, shape index: {}]   ;;  %s3355_s1 = inlined_call_operand.vmem [shape: bf16[2,2,5,128], index: 1, kind: input, shape index: {}]   ;;  %s3356_s2 = inlined_call_operand.vmem [shape: bf16[2,4,128,32], index: 2, kind: input, shape index: {}]   ;;  %s3357_s3 = inlined_call_operand.vmem [shape: f32[2,1,32], index: 3, kind: input, shape index: {}]   ;;  %s3358_s4 = inlined_call_operand.vmem [shape: bf16[2,3,32,32], index: 4, kind: input, shape index: {}]   ;;  %s3359_s5 = inlined_call_operand.vmem [shape: f32[2,1,32], index: 5, kind: input, shape index: {}]   ;;  %s3360_s6 = inlined_call_operand.vmem [shape: bf16[2,3,32,32], index: 6, kind: input, shape index: {}]   ;;  %s3361_s7 = inlined_call_operand.vmem [shape: f32[2,1,32], index: 7, kind: input, shape index: {}]   ;;  %s3362_s8 = inlined_call_operand.vmem [shape: bf16[2,4,32,128], index: 8, kind: input, shape index: {}]   ;;  %s3363_s9 = inlined_call_operand.vmem [shape: f32[2,1,128], index: 9, kind: input, shape index: {}]   ;;  %s3364_s10 = inlined_call_operand.vmem [shape: bf16[2,128,32], index: 10, kind: input, shape index: {}]   ;;  %s3365_s11 = inlined_call_operand.vmem [shape: bf16[2,32,128], index: 11, kind: input, shape index: {}]   ;;  %s3366_s12 = inlined_call_operand.vmem [shape: f32[2,1,128], index: 12, kind: input, shape index: {}]   ;;  %s3367_s13 = inlined_call_operand.vmem [shape: f32[2,2,2,4,128], index: 13, kind: output, shape index: {0}]   ;;  %s3368_s14 = inlined_call_operand.vmem [shape: f32[2,2,1,128], index: 14, kind: output, shape index: {1}]  }
   0x1   :  { %3369 = sst [smem:[#allocation2_spill]] %s3354_s0  ;;  %s3045_s15 = smov 0  }
   0x2   :  { %s3047_s16 = smov 0   ;;  %s3049_s17 = smov 0  }
   0x3 LB: > { %s34_s18 = sadd.s32 1, %s2953_s15  ;;  %s37_s19 = sadd.s32 1, %s2957_s16  ;;  %s2961_s17 = sphi %s3049_s17, %s25_s17   ;;  %s2957_s16 = sphi %s3047_s16, %s3378_s16   ;;  %s2953_s15 = sphi %s3045_s15, %s3377_s15   ;;  %s2949_s30 = sphi %s3043_s30, %s3376_s30   ;;  %s2945_s29 = sphi %s3041_s29, %s3375_s29  }
   0x4   : > { %p35_p0 = scmp.ge.s32.totalorder %s34_s18, 2  ;;  %p2362_p1 = scmp.ge.s32.totalorder %s2961_s17, 1 }
   0x5   : > { %p551_p2 = scmp.lt.s32.totalorder %s2961_s17, 5 }
   0x6   : > { %s3380_s18 = smov (%p35_p0, %s34_s18), 0  ;;  %s3382_s19 = smov (!%p35_p0, %s37_s19), %s2957_s16 }
   0x7   : > { %p552_p3 = pnand %p2362_p1, %p551_p2  ;;  %p39_p4 = scmp.ge.s32.totalorder %s3382_s19, 2 }
   0x8   : > { %p664_p5 = scmp.lt.s32.totalorder (!%p552_p3), %s2949_s30, 1  ;;  %p666_p6 = scmp.lt.s32.totalorder (!%p552_p3), %s2945_s29, 1 }
   0x9   : > { %s3384_s19 = smov (%p39_p4, %s3382_s19), 0  ;;  %555 = sbr.rel (%p552_p3) target bundleno = 1752 (0x6d8), region = 72 }
   0xa   : > { %s3370_s0 = sld [smem:[#allocation2_spill]] (!%p552_p3) }
   0xe   : > { %v2963_v0 = vmov 0.0   ;;  %s3386_s30 = smov (!%p664_p5, %s2949_s30), 1  ;;  %vm2964_vm0 = vmmov 0   ;;  %s3388_s29 = smov (!%p666_p6, %s2945_s29), 1  ;;  %vm1227_vm1 = vcmask 261120   ;;  %vm1207_vm2 = vcmask 1040384  }
   0xf   : > { %2625 = vmatprep.subr.bf16.mxu0 %v2963_v0  ;;  %2645 = vmatprep.subr.bf16.mxu1 %v2963_v0  ;;  %s2543_s20 = sshll.u32 %s3386_s30, 8  ;;  %s2363_s24 = sshll.u32 %s3386_s30, 1  ;;  %vm1208_vm3 = vsmask.f32 256  ;;  %vm1341_vm5 = vcmask 1041408   ;;  %vm1475_vm8 = vcmask 1043456  }
  0x10   : > { %2641 = vmatprep.mubr.msk.bf16.mxu0 %vm2964_vm0, %v2963_v0  ;;  %2661 = vmatprep.mubr.msk.bf16.mxu1 %vm2964_vm0, %v2963_v0  ;;  %s3085_s23 = scalar_lea.vmem %s3356_s2, %s2543_s20  ;;  %s3112_s25 = sadd.s32 %s2363_s24, %s3388_s29  ;;  %vm3197_vm4 = vmand %vm1207_vm2, %vm1208_vm3  ;;  %vm1342_vm6 = vsmask.f32 1280  ;;  %vm1608_vm13 = vcmask 257024  }
  0x11   : > { %v2859_v1 = vld [vmem:[%s3085_s23 + $0x38] sm:$0xff]   ;;  %v2861_v3 = vld [vmem:[%s3085_s23 + $0x30] sm:$0xff]   ;;  %v2863_v5 = vld [vmem:[%s3085_s23 + $0x28] sm:$0xff]   ;;  %s2364_s26 = sshll.u32 %s3112_s25, 2  ;;  %s687_s22 = scalar_lea.vmem %s3357_s3, %s3386_s30 }
  0x12   : > { %v2860_v2 = vld [vmem:[%s3085_s23 + $0x78] sm:$0xff]   ;;  %2626 = vmatpush3.bf16.msra.mxu0 %v2859_v1  ;;  %v2862_v4 = vld [vmem:[%s3085_s23 + $0x70] sm:$0xff]   ;;  %v2864_v6 = vld [vmem:[%s3085_s23 + $0x68] sm:$0xff]   ;;  %s671_s20 = scalar_lea.vmem %s3370_s0, %s2364_s26  ;;  %s679_s24 = scalar_lea.vmem %s3355_s1, %s2364_s26 }
  0x13   : > { %2646 = vmatpush3.bf16.msra.mxu1 %v2860_v2  ;;  %2627 = vmatprep.subr.bf16.mxu0 %v2963_v0  ;;  %v2865_v7 = vld [vmem:[%s3085_s23 + $0x20] sm:$0xff]   ;;  %v2867_v9 = vld [vmem:[%s3085_s23 + $0x18] sm:$0xff]   ;;  %v2869_v11 = vld [vmem:[%s3085_s23 + $0x10] sm:$0xff]   ;;  %s2813_s26 = smul.u32 48, %s3386_s30  ;;  %s724_s27 = scalar_lea.vmem %s3366_s12, %s3386_s30 }
  0x14   : > { %2647 = vmatprep.subr.bf16.mxu1 %v2963_v0  ;;  %v2866_v8 = vld [vmem:[%s3085_s23 + $0x60] sm:$0xff]   ;;  %v2868_v10 = vld [vmem:[%s3085_s23 + $0x58] sm:$0xff]   ;;  %v2870_v12 = vld [vmem:[%s3085_s23 + $0x50] sm:$0xff]   ;;  %s703_s0 = scalar_lea.vmem %s3361_s7, %s3386_s30 }
  0x15   : > { %v2871_v13 = vld [vmem:[%s3085_s23 + $0x8] sm:$0xff]   ;;  %v2873_v15 = vld [vmem:[%s3085_s23] sm:$0xff]   ;;  %v2877_v19 = vld [vmem:[%s3085_s23 + $0xb8] sm:$0xff]   ;;  %s3180_s28 = scalar_lea.vmem %s3358_s4, %s2813_s26 }
  0x16   : > { %2628 = vmatpush3.bf16.msra.mxu0 %v2861_v3  ;;  %v2872_v14 = vld [vmem:[%s3085_s23 + $0x48] sm:$0xff]   ;;  %v2874_v16 = vld [vmem:[%s3085_s23 + $0x40] sm:$0xff]   ;;  %v2878_v20 = vld [vmem:[%s3085_s23 + $0xf8] sm:$0xff]  }
  0x17   : > { %2648 = vmatpush3.bf16.msra.mxu1 %v2862_v4  ;;  %2629 = vmatprep.subr.bf16.mxu0 %v2963_v0  ;;  %v742_v17 = vld [vmem:[%s671_s20] sm:$0x7]  ;;  %v2879_v21 = vld [vmem:[%s3085_s23 + $0xb0] sm:$0xff]   ;;  %v2881_v23 = vld [vmem:[%s3085_s23 + $0xa8] sm:$0xff]  }
  0x18   : > { %2649 = vmatprep.subr.bf16.mxu1 %v2963_v0  ;;  %v743_v18 = vld [vmem:[%s679_s24] sm:$0x7]  ;;  %v2880_v22 = vld [vmem:[%s3085_s23 + $0xf0] sm:$0xff]   ;;  %v2882_v24 = vld [vmem:[%s3085_s23 + $0xe8] sm:$0xff]   ;;  %v2430_v29 = vcombine.low %v742_v17, %v742_v17  ;;  %s2546_s24 = sshll.u32 %s3386_s30, 4 }
  0x19   : > { %v2883_v25 = vld [vmem:[%s3085_s23 + $0xa0] sm:$0xff]   ;;  %v2885_v27 = vld [vmem:[%s3085_s23 + $0x98] sm:$0xff]   ;;  %v2455_v30 = vcombine.low %v743_v18, %v743_v18  ;;  %v2887_v31 = vld [vmem:[%s3085_s23 + $0x90] sm:$0xff]  }
  0x1a   : > { %2630 = vmatpush3.bf16.msra.mxu0 %v2863_v5  ;;  %v2884_v26 = vld [vmem:[%s3085_s23 + $0xe0] sm:$0xff]   ;;  %v2886_v28 = vld [vmem:[%s3085_s23 + $0xd8] sm:$0xff]   ;;  %v2888_v32 = vld [vmem:[%s3085_s23 + $0xd0] sm:$0xff]   ;;  %v985_v33 = vshll.u32 %v2430_v29, 16  ;;  %v983_v37 = vshrl.u32 %v2430_v29, 16 }
  0x1b   : > { %2650 = vmatpush3.bf16.msra.mxu1 %v2864_v6  ;;  %2631 = vmatprep.subr.bf16.mxu0 %v2963_v0  ;;  %v1102_v34 = vshll.u32 %v2455_v30, 16  ;;  %v2889_v35 = vld [vmem:[%s3085_s23 + $0x88] sm:$0xff]   ;;  %v1100_v39 = vshrl.u32 %v2455_v30, 16  ;;  %v2891_v41 = vld [vmem:[%s3085_s23 + $0x80] sm:$0xff]   ;;  %v2893_v45 = vld [vmem:[%s3180_s28 + $0x18] sm:$0xff]  }
  0x1c   : > { %2651 = vmatprep.subr.bf16.mxu1 %v2963_v0  ;;  %v2890_v36 = vld [vmem:[%s3085_s23 + $0xc8] sm:$0xff]   ;;  %v987_v38 = vrot.slane %v985_v33, 1  ;;  %v2892_v42 = vld [vmem:[%s3085_s23 + $0xc0] sm:$0xff]   ;;  %v2894_v46 = vld [vmem:[%s3180_s28 + $0x10] sm:$0xff]   ;;  %s740_s23 = scalar_lea.vmem %s3368_s14, %s3112_s25  ;;  %s2378_s25 = sshll.u32 %s3386_s30, 2 }
  0x1d   : > { %v1104_v40 = vrot.slane %v1102_v34, 1  ;;  %v2895_v47 = vld [vmem:[%s3180_s28 + $0x8] sm:$0xff]   ;;  %v2896_v48 = vld [vmem:[%s3180_s28] sm:$0xff]   ;;  %vm3209_vm7 = vmand %vm1341_vm5, %vm1342_vm6 }
  0x1e   : > { %2632 = vmatpush3.bf16.msra.mxu0 %v2865_v7  ;;  %v988_v43 = vor.u32 %v987_v38, %v983_v37  ;;  %v2389_v57 = vld [vmem:[%s687_s22] ss:$0 sm:$0xff]  ;;  %s695_s22 = scalar_lea.vmem %s3359_s5, %s3386_s30 }
  0x1f   : > { %2652 = vmatpush3.bf16.msra.mxu1 %v2866_v8  ;;  %2633 = vmatprep.subr.bf16.mxu0 %v2963_v0  ;;  %v1105_v44 = vor.u32 %v1104_v40, %v1100_v39 }
  0x20   : > { %2653 = vmatprep.subr.bf16.mxu1 %v2963_v0 }
  0x22   : > { %2634 = vmatpush3.bf16.msra.mxu0 %v2867_v9 }
  0x23   : > { %2654 = vmatpush3.bf16.msra.mxu1 %v2868_v10  ;;  %2635 = vmatprep.subr.bf16.mxu0 %v2963_v0 }
  0x24   : > { %2655 = vmatprep.subr.bf16.mxu1 %v2963_v0 }
  0x26   : > { %2636 = vmatpush3.bf16.msra.mxu0 %v2869_v11 }
  0x27   : > { %2656 = vmatpush3.bf16.msra.mxu1 %v2870_v12  ;;  %2637 = vmatprep.subr.bf16.mxu0 %v2963_v0 }
  0x28   : > { %2657 = vmatprep.subr.bf16.mxu1 %v2963_v0 }
  0x2a   : > { %2638 = vmatpush3.bf16.msra.mxu0 %v2871_v13 }
  0x2b   : > { %2658 = vmatpush3.bf16.msra.mxu1 %v2872_v14  ;;  %2639 = vmatprep.subr.bf16.mxu0 %v2963_v0  ;;  %v2897_v14 = vld [vmem:[%s3180_s28 + $0x28] sm:$0xff]  }
  0x2c   : > { %2659 = vmatprep.subr.bf16.mxu1 %v2963_v0 }
  0x2e   : > { %2640 = vmatpush3.bf16.msra.mxu0 %v2873_v15 }
  0x2f   : > { %2660 = vmatpush3.bf16.msra.mxu1 %v2874_v16  ;;  %2665 = vmatprep.subr.bf16.mxu0 %v2963_v0 }
  0x30   : > { %2685 = vmatprep.subr.bf16.mxu1 %v2963_v0 }
  0x31   : > { %2642 = vmatmul.mubr.bf16.vlgmr.msra.gmra.mxu0 %v742_v17  ;;  %v2898_v17 = vld [vmem:[%s3180_s28 + $0x20] sm:$0xff]   ;;  %s721_s28 = scalar_lea.vmem %s3365_s11, %s2546_s24  ;;  %s711_s24 = scalar_lea.vmem %s3363_s9, %s3386_s30 }
  0x32   : > { %2662 = vmatmul.mubr.bf16.vlgmr.msra.gmra.mxu1 %v743_v18  ;;  %2666 = vmatpush3.bf16.msra.mxu0 %v2877_v19 }
  0x33   : > { %2686 = vmatpush3.bf16.msra.mxu1 %v2878_v20  ;;  %2667 = vmatprep.subr.bf16.mxu0 %v2963_v0 }
  0x34   : > { %2687 = vmatprep.subr.bf16.mxu1 %v2963_v0  ;;  %2681 = vmatprep.mubr.msk.bf16.mxu0 %vm2964_vm0, %v2963_v0 }
  0x35   : > { %2701 = vmatprep.mubr.msk.bf16.mxu1 %vm2964_vm0, %v2963_v0 }
  0x36   : > { %2668 = vmatpush3.bf16.msra.mxu0 %v2879_v21  ;;  %v2899_v21 = vld [vmem:[%s721_s28 + $0x8] sm:$0xff]  }
  0x37   : > { %2688 = vmatpush3.bf16.msra.mxu1 %v2880_v22  ;;  %2669 = vmatprep.subr.bf16.mxu0 %v2963_v0  ;;  %v2900_v22 = vld [vmem:[%s721_s28] sm:$0xff]   ;;  %s2544_s28 = sshll.u32 %s3386_s30, 6 }
  0x38   : > { %2689 = vmatprep.subr.bf16.mxu1 %v2963_v0  ;;  %s3294_s21 = scalar_lea.vmem %s3362_s8, %s2544_s28 }
  0x3a   : > { %2670 = vmatpush3.bf16.msra.mxu0 %v2881_v23 }
  0x3b   : > { %2690 = vmatpush3.bf16.msra.mxu1 %v2882_v24  ;;  %2671 = vmatprep.subr.bf16.mxu0 %v2963_v0 }
  0x3c   : > { %2691 = vmatprep.subr.bf16.mxu1 %v2963_v0 }
  0x3e   : > { %2672 = vmatpush3.bf16.msra.mxu0 %v2883_v25 }
  0x3f   : > { %2692 = vmatpush3.bf16.msra.mxu1 %v2884_v26  ;;  %2673 = vmatprep.subr.bf16.mxu0 %v2963_v0 }
  0x40   : > { %2693 = vmatprep.subr.bf16.mxu1 %v2963_v0 }
  0x42   : > { %2674 = vmatpush3.bf16.msra.mxu0 %v2885_v27  ;;  %v2467_v27 = vld [vmem:[%s695_s22] ss:$0 sm:$0xff]  ;;  %s716_s22 = scalar_lea.vmem %s3364_s10, %s2544_s28 }
  0x43   : > { %2694 = vmatpush3.bf16.msra.mxu1 %v2886_v28  ;;  %2675 = vmatprep.subr.bf16.mxu0 %v2963_v0 }
  0x44   : > { %2695 = vmatprep.subr.bf16.mxu1 %v2963_v0 }
  0x46   : > { %2676 = vmatpush3.bf16.msra.mxu0 %v2887_v31 }
  0x47   : > { %2696 = vmatpush3.bf16.msra.mxu1 %v2888_v32  ;;  %2677 = vmatprep.subr.bf16.mxu0 %v2963_v0 }
  0x48   : > { %2697 = vmatprep.subr.bf16.mxu1 %v2963_v0 }
  0x4a   : > { %2678 = vmatpush3.bf16.msra.mxu0 %v2889_v35 }
  0x4b   : > { %2698 = vmatpush3.bf16.msra.mxu1 %v2890_v36  ;;  %2679 = vmatprep.subr.bf16.mxu0 %v2963_v0 }
  0x4c   : > { %2699 = vmatprep.subr.bf16.mxu1 %v2963_v0 }
  0x4e   : > { %2680 = vmatpush3.bf16.msra.mxu0 %v2891_v41  ;;  %v2485_v41 = vld [vmem:[%s724_s27] ss:$0 sm:$0xff]  ;;  %s3261_s27 = scalar_lea.vmem %s3360_s6, %s2813_s26 }
  0x4f   : > { %2700 = vmatpush3.bf16.msra.mxu1 %v2892_v42  ;;  %2705 = vmatprep.subr.bf16.mxu0 %v2963_v0 }
  0x50   : > { %2713 = vmatprep.subr.bf16.mxu1 %v2963_v0 }
  0x51   : > { %2682 = vmatmul.mubr.bf16.vlgmr.msra.gmra.mxu0 %v988_v43 }
  0x52   : > { %2702 = vmatmul.mubr.bf16.vlgmr.msra.gmra.mxu1 %v1105_v44  ;;  %2709 = vmatprep.mubr.msk.bf16.mxu0 %vm2964_vm0, %v2963_v0 }
  0x53   : > { %2717 = vmatprep.mubr.msk.bf16.mxu1 %vm2964_vm0, %v2963_v0  ;;  %2714 = vmatpush3.bf16.msra.mxu1 %v2893_v45 }
  0x54   : > { %2715 = vmatprep.subr.bf16.mxu1 %v2963_v0  ;;  %2706 = vmatpush3.bf16.msra.mxu0 %v2895_v47 }
  0x55   : > { %2707 = vmatprep.subr.bf16.mxu0 %v2963_v0 }
  0x57   : > { %2716 = vmatpush3.bf16.msra.mxu1 %v2894_v46 }
  0x58   : > { %2729 = vmatprep.subr.bf16.mxu1 %v2963_v0  ;;  %2708 = vmatpush3.bf16.msra.mxu0 %v2896_v48  ;;  %v1479_v48 = vlaneseq }
  0x59   : > { %2721 = vmatprep.subr.bf16.mxu0 %v2963_v0 }
  0xf1   : > { %v843_v49 = vpop.f32.mrf.mxu0 }
  0xf2   : > { %v955_v50 = vpop.f32.mrf.mxu1  ;;  %v855_v58 = vadd.f32 %v2389_v57, %v843_v49  ;;  %v1480_v49 = vand.u32 127, %v1479_v48  ;;  %v2903_v57 = vld [vmem:[%s716_s22 + $0x28] sm:$0xff]  }
  0xf3   : > { %v2643_v51 = vpop.f32.mrf.mxu0 }
  0xf4   : > { %v2663_v52 = vpop.f32.mrf.mxu1  ;;  %v961_v59 = vadd.f32 %v955_v50, %v855_v58  ;;  %v2904_v58 = vld [vmem:[%s716_s22 + $0x20] sm:$0xff]  }
  0xf5   : > { %v846_v53 = vpop.f32.mrf.mxu0 }
  0xf6   : > { %v958_v54 = vpop.f32.mrf.mxu1 }
  0xf7   : > { %v2644_v55 = vpop.f32.mrf.mxu0 }
  0xf8   : > { %v2664_v56 = vpop.f32.mrf.mxu1  ;;  %v2901_v55 = vld [vmem:[%s716_s22 + $0x38] sm:$0xff]  }
  0xf9   : > { %v2902_v56 = vld [vmem:[%s716_s22 + $0x30] sm:$0xff]  }
 0x111   : > { %v1072_v60 = vpop.f32.mrf.mxu0 }
 0x112   : > { %v1078_v61 = vadd.f32 %v1072_v60, %v961_v59  ;;  %v1189_v62 = vpop.f32.mrf.mxu1  ;;  %v2905_v59 = vld [vmem:[%s716_s22 + $0x18] sm:$0xff]   ;;  %v2906_v60 = vld [vmem:[%s716_s22 + $0x10] sm:$0xff]  }
 0x113   : > { %v2683_v63 = vpop.f32.mrf.mxu0 }
 0x114   : > { %v1195_v1 = vadd.f32 %v1189_v62, %v1078_v61  ;;  %v2703_v2 = vpop.f32.mrf.mxu1  ;;  %v2907_v61 = vld [vmem:[%s716_s22 + $0x8] sm:$0xff]  }
 0x115   : > { %v1075_v3 = vpop.f32.mrf.mxu0 }
 0x116   : > { %v1196_v4 = vmax.f32 %v1195_v1, 0.0  ;;  %v1192_v5 = vpop.f32.mrf.mxu1  ;;  %v2908_v3 = vld [vmem:[%s716_s22] sm:$0xff]  }
 0x117   : > { %v2684_v6 = vpop.f32.mrf.mxu0 }
 0x118   : > { %v1197_v7 = vpack.c.bf16 %v1196_v4, %v1196_v4  ;;  %v2704_v8 = vpop.f32.mrf.mxu1 }
 0x11a   : > { %v1200_v9 = vshrl.u32 %v1197_v7, 16  ;;  %2718 = vmatmul.mubr.msk.bf16.vlgmr.msra.gmra.mxu1 %vm1227_vm1, %v1197_v7  ;;  %v1203_v11 = vshll.u32 %v1197_v7, 16 }
 0x11b   : > { %2733 = vmatprep.mubr.msk.bf16.mxu1 %vm2964_vm0, %v2963_v0  ;;  %2730 = vmatpush3.bf16.msra.mxu1 %v2899_v21 }
 0x11c   : > { %v1202_v10 = vrot.slane %v1200_v9, 7  ;;  %v1338_v15 = vrot.slane %v1203_v11, 1  ;;  %2731 = vmatprep.subr.bf16.mxu1 %v2963_v0 }
 0x11e   : > { %v1205_v13 = vor.u32 %v1203_v11, %v1202_v10  ;;  %v1339_v18 = vor.u32 %v1338_v15, %v1200_v9  ;;  %v2965_v9 = vmov 1.0|1.0   ;;  %v2909_v10 = vld [vmem:[%s3261_s27 + $0x8] sm:$0xff]   ;;  %v2910_v11 = vld [vmem:[%s3261_s27] sm:$0xff]  }
 0x11f   : > { %2732 = vmatpush3.bf16.msra.mxu1 %v2900_v22 }
 0x120   : > { %v1210_v16 = vsel %vm3197_vm4, 0, %v1205_v13  ;;  %v1344_v20 = vsel %vm3209_vm7, %v1339_v18, 0  ;;  %2757 = vmatprep.subr.bf16.mxu1 %v2963_v0 }
 0x121   : > { %2710 = vmatmul.mubr.msk.bf16.vlgmr.msra.gmra.mxu0 %vm1227_vm1, %v1210_v16 }
 0x122   : > { %2722 = vmatpush3.bf16.msra.mxu0 %v2897_v14  ;;  %2725 = vmatprep.mubr.msk.bf16.mxu0 %vm2964_vm0, %v2963_v0 }
 0x123   : > { %2723 = vmatprep.subr.bf16.mxu0 %v2963_v0 }
 0x126   : > { %2724 = vmatpush3.bf16.msra.mxu0 %v2898_v17 }
 0x127   : > { %2737 = vmatprep.subr.bf16.mxu0 %v2963_v0 }
 0x129   : > { %2726 = vmatmul.mubr.msk.bf16.vlgmr.msra.gmra.mxu0 %vm1227_vm1, %v1344_v20 }
 0x12a   : > { %2753 = vmatprep.mubr.msk.bf16.mxu0 %vm2964_vm0, %v2963_v0  ;;  %2738 = vmatpush3.bf16.msra.mxu0 %v2901_v55 }
 0x12b   : > { %2739 = vmatprep.subr.bf16.mxu0 %v2963_v0 }
 0x12e   : > { %2740 = vmatpush3.bf16.msra.mxu0 %v2902_v56 }
 0x12f   : > { %2741 = vmatprep.subr.bf16.mxu0 %v2963_v0 }
 0x132   : > { %2742 = vmatpush3.bf16.msra.mxu0 %v2903_v57 }
 0x133   : > { %2743 = vmatprep.subr.bf16.mxu0 %v2963_v0 }
 0x136   : > { %2744 = vmatpush3.bf16.msra.mxu0 %v2904_v58 }
 0x137   : > { %2745 = vmatprep.subr.bf16.mxu0 %v2963_v0 }
 0x13a   : > { %2746 = vmatpush3.bf16.msra.mxu0 %v2905_v59 }
 0x13b   : > { %2747 = vmatprep.subr.bf16.mxu0 %v2963_v0 }
 0x13e   : > { %2748 = vmatpush3.bf16.msra.mxu0 %v2906_v60 }
 0x13f   : > { %2749 = vmatprep.subr.bf16.mxu0 %v2963_v0 }
 0x142   : > { %2750 = vmatpush3.bf16.msra.mxu0 %v2907_v61 }
 0x143   : > { %2751 = vmatprep.subr.bf16.mxu0 %v2963_v0 }
 0x146   : > { %2752 = vmatpush3.bf16.msra.mxu0 %v2908_v3  ;;  %v2920_v3 = vld [vmem:[%s3294_s21 + $0x20] sm:$0xff]  }
 0x147   : > { %2789 = vmatprep.subr.bf16.mxu0 %v2963_v0 }
 0x1da   : > { %v1331_v23 = vpop.f32.mrf.mxu1 }
 0x1dc   : > { %v2719_v24 = vpop.f32.mrf.mxu1 }
 0x1de   : > { %v1334_v25 = vpop.f32.mrf.mxu1 }
 0x1e0   : > { %v2720_v26 = vpop.f32.mrf.mxu1 }
 0x1e1   : > { %v1265_v28 = vpop.f32.mrf.mxu0  ;;  %v2911_v26 = vld [vmem:[%s3261_s27 + $0x18] sm:$0xff]  }
 0x1e2   : > { %v1277_v30 = vadd.f32 %v2467_v27, %v1265_v28  ;;  %v2912_v28 = vld [vmem:[%s3261_s27 + $0x10] sm:$0xff]  }
 0x1e3   : > { %v2711_v29 = vpop.f32.mrf.mxu0 }
 0x1e4   : > { %v1337_v33 = vadd.f32 %v1331_v23, %v1277_v30  ;;  %v2913_v29 = vld [vmem:[%s3261_s27 + $0x28] sm:$0xff]  }
 0x1e5   : > { %v1268_v31 = vpop.f32.mrf.mxu0 }
 0x1e6   : > { %v2914_v31 = vld [vmem:[%s3261_s27 + $0x20] sm:$0xff]  }
 0x1e7   : > { %v2712_v32 = vpop.f32.mrf.mxu0 }
 0x1e9   : > { %v1399_v34 = vpop.f32.mrf.mxu0 }
 0x1ea   : > { %v3229_v35 = vadd.f32 %v1399_v34, %v1337_v33  ;;  %v2915_v34 = vld [vmem:[%s3294_s21 + $0x18] sm:$0xff]  }
 0x1eb   : > { %v2727_v36 = vpop.f32.mrf.mxu0 }
 0x1ec   : > { %v1410_v37 = vpack.c.bf16 %v3229_v35, %v3229_v35  ;;  %v2917_v36 = vld [vmem:[%s3294_s21 + $0x38] sm:$0xff]  }
 0x1ed   : > { %v1402_v38 = vpop.f32.mrf.mxu0 }
 0x1ee   : > { %2734 = vmatmul.mubr.msk.bf16.vlgmr.msra.gmra.mxu1 %vm1227_vm1, %v1410_v37  ;;  %v2919_v37 = vld [vmem:[%s3294_s21 + $0x30] sm:$0xff]  }
 0x1ef   : > { %v2728_v39 = vpop.f32.mrf.mxu0  ;;  %2761 = vmatprep.mubr.msk.bf16.mxu1 %vm2964_vm0, %v2963_v0  ;;  %2758 = vmatpush3.bf16.msra.mxu1 %v2909_v10  ;;  %v2922_v10 = vld [vmem:[%s3294_s21] sm:$0xff]  }
 0x1f0   : > { %2759 = vmatprep.subr.bf16.mxu1 %v2963_v0 }
 0x1f3   : > { %2760 = vmatpush3.bf16.msra.mxu1 %v2910_v11 }
 0x1f4   : > { %2765 = vmatprep.subr.bf16.mxu1 %v2963_v0 }
 0x2ae   : > { %v1460_v40 = vpop.f32.mrf.mxu1 }
 0x2af   : > { %v1467_v42 = vmul.f32 2.0, %v1460_v40 }
 0x2b0   : > { %v2735_v43 = vpop.f32.mrf.mxu1 }
 0x2b1   : > { %v1474_v44 = vsub.f32 %v2485_v41, %v1467_v42 }
 0x2b2   : > { %v1463_v45 = vpop.f32.mrf.mxu1 }
 0x2b3   : > { %v1476_v46 = vsel %vm1475_vm8, %v1474_v44, inf }
 0x2b4   : > { %1477 = vmin.xlane.f32.xlu0 %v1476_v46  ;;  %v2736_v47 = vpop.f32.mrf.mxu1 }
 0x33d   : > { %v1478_v50 = vpop.xlane.xlu0 %1477 }
 0x33e   : > { %vm1481_vm9 = vcmp.le.f32.partialorder %v1474_v44, %v1478_v50 }
 0x33f   : > { %v1482_v51 = vsel %vm1481_vm9, %v1480_v49, 128 }
 0x340   : > { %v1483_v52 = vsel %vm1475_vm8, %v1482_v51, 2147483647  ;;  %v2500_v51 = vld [vmem:[%s703_s0] ss:$0 sm:$0xff]  ;;  %s2377_s0 = sshll.u32 %s3388_s29, 1 }
 0x341   : > { %v1485_v53 = vshra.s32 %v1483_v52, 16  ;;  %v1484_v62 = vand.u32 65535, %v1483_v52 }
 0x343   : > { %v1487_v54 = vcvt.s32.f32 %v1485_v53  ;;  %v1486_v1 = vcvt.s32.f32 %v1484_v62  ;;  %v2918_v62 = vld [vmem:[%s3294_s21 + $0x28] sm:$0xff]  }
 0x345   : > { %1488 = vmin.xlane.f32.xlu0 %v1487_v54 }
 0x3ce   : > { %v1489_v63 = vpop.xlane.xlu0 %1488 }
 0x3cf   : > { %vm1490_vm10 = vcmp.eq.f32.partialorder %v1487_v54, %v1489_v63  ;;  %v1495_v4 = vcvt.f32.s32 %v1489_v63 }
 0x3d0   : > { %v1491_v2 = vsel %vm1490_vm10, %v1486_v1, inf }
 0x3d1   : > { %1492 = vmin.xlane.f32.xlu1 %v1491_v2  ;;  %v1496_v6 = vshll.u32 %v1495_v4, 16 }
 0x45a   : > { %v1493_v5 = vpop.xlane.xlu1 %1492 }
 0x45b   : > { %v1494_v7 = vcvt.f32.s32 %v1493_v5 }
 0x45d   : > { %v1497_v8 = vadd.s32 %v1496_v6, %v1494_v7  ;;  %v2921_v7 = vld [vmem:[%s3294_s21 + $0x8] sm:$0xff]  }
 0x45f   : > { %vm1498_vm11 = vcmp.eq.s32.totalorder %v1480_v49, %v1497_v8 }
 0x460   : > { %vm2495_vm12 = vmpackc.low %vm1498_vm11, %vm1498_vm11 }
 0x461   : > { %2754 = vmatmul.mubr.msk.bf16.vlgmr.msra.gmra.mxu0 %vm2495_vm12, %v2965_v9 }
 0x462   : > { %2793 = vmatprep.mubr.msk.bf16.mxu0 %vm2964_vm0, %v2963_v0  ;;  %2790 = vmatpush3.bf16.msra.mxu0 %v2917_v36 }
 0x463   : > { %2791 = vmatprep.subr.bf16.mxu0 %v2963_v0 }
 0x466   : > { %2792 = vmatpush3.bf16.msra.mxu0 %v2919_v37 }
 0x467   : > { %2805 = vmatprep.subr.bf16.mxu0 %v2963_v0 }
 0x521   : > { %v1600_v13 = vpop.f32.mrf.mxu0 }
 0x522   : > { %v1606_v14 = vsub.f32 %v3229_v35, %v1600_v13  ;;  %v1622_v15 = vpack.c.bf16 %v1600_v13, %v1600_v13  ;;  %v2916_v35 = vld [vmem:[%s3294_s21 + $0x10] sm:$0xff]   ;;  %s731_s21 = sadd.s32 %s2378_s25, %s2377_s0 }
 0x523   : > { %v2755_v16 = vpop.f32.mrf.mxu0 }
 0x524   : > { %v1607_v17 = vmul.f32 %v1606_v14, %v1606_v14  ;;  %v1625_v18 = vshrl.u32 %v1622_v15, 16  ;;  %v1628_v22 = vshll.u32 %v1622_v15, 16 }
 0x525   : > { %v1603_v20 = vpop.f32.mrf.mxu0 }
 0x526   : > { %v1627_v21 = vrot.slane %v1625_v18, 7  ;;  %v1609_v23 = vsel %vm1608_vm13, %v1607_v17, 0.0  ;;  %v1759_v30 = vrot.slane %v1628_v22, 1 }
 0x527   : > { %1610 = vadd.xlane.f32.xlu1 %v1609_v23  ;;  %v2756_v24 = vpop.f32.mrf.mxu0 }
 0x528   : > { %v1630_v25 = vor.u32 %v1628_v22, %v1627_v21  ;;  %v1760_v32 = vor.u32 %v1759_v30, %v1625_v18 }
 0x52a   : > { %v1632_v27 = vsel %vm3197_vm4, 0, %v1630_v25  ;;  %v1762_v33 = vsel %vm3209_vm7, %v1760_v32, 0 }
 0x52b   : > { %2762 = vmatmul.mubr.msk.bf16.vlgmr.msra.gmra.mxu1 %vm1227_vm1, %v1632_v27 }
 0x52c   : > { %2766 = vmatpush3.bf16.msra.mxu1 %v2911_v26  ;;  %2769 = vmatprep.mubr.msk.bf16.mxu1 %vm2964_vm0, %v2963_v0 }
 0x52d   : > { %2767 = vmatprep.subr.bf16.mxu1 %v2963_v0 }
 0x530   : > { %2768 = vmatpush3.bf16.msra.mxu1 %v2912_v28 }
 0x531   : > { %2773 = vmatprep.subr.bf16.mxu1 %v2963_v0 }
 0x533   : > { %2770 = vmatmul.mubr.msk.bf16.vlgmr.msra.gmra.mxu1 %vm1227_vm1, %v1622_v15  ;;  %v2522_v15 = vld [vmem:[%s711_s24] ss:$0 sm:$0xff] }
 0x534   : > { %2774 = vmatpush3.bf16.msra.mxu1 %v2913_v29  ;;  %2777 = vmatprep.mubr.msk.bf16.mxu1 %vm2964_vm0, %v2963_v0 }
 0x535   : > { %2775 = vmatprep.subr.bf16.mxu1 %v2963_v0 }
 0x538   : > { %2776 = vmatpush3.bf16.msra.mxu1 %v2914_v31 }
 0x539   : > { %2781 = vmatprep.subr.bf16.mxu1 %v2963_v0 }
 0x53b   : > { %2778 = vmatmul.mubr.msk.bf16.vlgmr.msra.gmra.mxu1 %vm1227_vm1, %v1762_v33 }
 0x53c   : > { %2785 = vmatprep.mubr.msk.bf16.mxu1 %vm2964_vm0, %v2963_v0  ;;  %2782 = vmatpush3.bf16.msra.mxu1 %v2915_v34 }
 0x53d   : > { %2783 = vmatprep.subr.bf16.mxu1 %v2963_v0 }
 0x540   : > { %2784 = vmatpush3.bf16.msra.mxu1 %v2916_v35 }
 0x541   : > { %2797 = vmatprep.subr.bf16.mxu1 %v2963_v0 }
 0x5b0   : > { %v1611_v38 = vpop.xlane.xlu1 %1610 }
 0x5b1   : > { %v1612_v39 = vrot.slane %v1611_v38, 4 }
 0x5b3   : > { %v1613_v40 = vadd.f32 %v1612_v39, %v1611_v38 }
 0x5b5   : > { %v1614_v41 = vrot.slane %v1613_v40, 2 }
 0x5b7   : > { %v1615_v42 = vadd.f32 %v1614_v41, %v1613_v40 }
 0x5b9   : > { %v1616_v43 = vrot.slane %v1615_v42, 1 }
 0x5bb   : > { %v1617_v44 = vadd.f32 %v1616_v43, %v1615_v42 }
 0x5bd   : > { %2814 = vpush %v1617_v44 }
 0x5eb   : > { %v1686_v45 = vpop.f32.mrf.mxu1 }
 0x5ec   : > { %v1698_v54 = vadd.f32 %v2500_v51, %v1686_v45 }
 0x5ed   : > { %v2763_v46 = vpop.f32.mrf.mxu1 }
 0x5ee   : > { %s2815_s28 = spop %2814 }
 0x5ef   : > { %s1621_s27 = smul.f32 0.0078125, %s2815_s28  ;;  %v1689_v47 = vpop.f32.mrf.mxu1 }
 0x5f1   : > { %v2088_v48 = vstv %s1621_s27  ;;  %v2764_v49 = vpop.f32.mrf.mxu1 }
 0x5f2   : > { %2089 = vst [vmem:[%s740_s23] sm:$0x1] %v2088_v48  ;;  %s2379_s23 = sshll.u32 %s731_s21, 2 }
 0x5f3   : > { %v1752_v50 = vpop.f32.mrf.mxu1  ;;  %s733_s20 = scalar_lea.vmem %s3367_s13, %s2379_s23 }
 0x5f4   : > { %v1758_v56 = vadd.f32 %v1752_v50, %v1698_v54 }
 0x5f5   : > { %v2771_v52 = vpop.f32.mrf.mxu1 }
 0x5f7   : > { %v1755_v53 = vpop.f32.mrf.mxu1 }
 0x5f9   : > { %v2772_v55 = vpop.f32.mrf.mxu1 }
 0x5fb   : > { %v1817_v57 = vpop.f32.mrf.mxu1 }
 0x5fc   : > { %v1823_v58 = vadd.f32 %v1817_v57, %v1758_v56 }
 0x5fd   : > { %v2779_v59 = vpop.f32.mrf.mxu1 }
 0x5fe   : > { %v1824_v60 = vmax.f32 %v1823_v58, 0.0 }
 0x5ff   : > { %v1820_v61 = vpop.f32.mrf.mxu1 }
 0x600   : > { %v1825_v63 = vpack.c.bf16 %v1824_v60, %v1824_v60 }
 0x601   : > { %v2780_v1 = vpop.f32.mrf.mxu1 }
 0x602   : > { %v1894_v2 = vshrl.u32 %v1825_v63, 16  ;;  %2786 = vmatmul.mubr.msk.bf16.vlgmr.msra.gmra.mxu1 %vm1227_vm1, %v1825_v63  ;;  %v1897_v4 = vshll.u32 %v1825_v63, 16 }
 0x603   : > { %2798 = vmatpush3.bf16.msra.mxu1 %v2918_v62  ;;  %2801 = vmatprep.mubr.msk.bf16.mxu1 %vm2964_vm0, %v2963_v0 }
 0x604   : > { %2799 = vmatprep.subr.bf16.mxu1 %v2963_v0  ;;  %v1896_v5 = vrot.slane %v1894_v2, 7  ;;  %v2021_v9 = vrot.slane %v1897_v4, 1 }
 0x606   : > { %v1899_v6 = vor.u32 %v1897_v4, %v1896_v5  ;;  %v2022_v11 = vor.u32 %v2021_v9, %v1894_v2 }
 0x607   : > { %2800 = vmatpush3.bf16.msra.mxu1 %v2920_v3 }
 0x608   : > { %v1901_v8 = vsel %vm3197_vm4, 0, %v1899_v6  ;;  %v2024_v13 = vsel %vm3209_vm7, %v2022_v11, 0 }
 0x609   : > { %2794 = vmatmul.mubr.msk.bf16.vlgmr.msra.gmra.mxu0 %vm1227_vm1, %v1901_v8 }
 0x60a   : > { %2806 = vmatpush3.bf16.msra.mxu0 %v2921_v7  ;;  %2802 = vmatmul.mubr.msk.bf16.vlgmr.msra.gmra.mxu1 %vm1227_vm1, %v1825_v63 }
 0x60b   : > { %2807 = vmatprep.subr.bf16.mxu0 %v2963_v0  ;;  %2809 = vmatprep.mubr.msk.bf16.mxu0 %vm2964_vm0, %v2963_v0 }
 0x60e   : > { %2808 = vmatpush3.bf16.msra.mxu0 %v2922_v10 }
 0x611   : > { %2810 = vmatmul.mubr.msk.bf16.vlgmr.msra.gmra.mxu0 %vm1227_vm1, %v2024_v13 }
 0x6c2   : > { %v1881_v12 = vpop.f32.mrf.mxu1 }
 0x6c3   : > { %v1893_v0 = vadd.f32 %v2522_v15, %v1881_v12 }
 0x6c4   : > { %v2787_v14 = vpop.f32.mrf.mxu1 }
 0x6c6   : > { %v1884_v16 = vpop.f32.mrf.mxu1 }
 0x6c8   : > { %v2788_v17 = vpop.f32.mrf.mxu1 }
 0x6c9   : > { %v1956_v19 = vpop.f32.mrf.mxu0 }
 0x6ca   : > { %v1962_v18 = vadd.f32 %v1956_v19, %v1893_v0  ;;  %v2014_v20 = vpop.f32.mrf.mxu1 }
 0x6cb   : > { %v2795_v21 = vpop.f32.mrf.mxu0  ;;  %v2020_v26 = vadd.f32 %v2522_v15, %v2014_v20 }
 0x6cc   : > { %2085 = vst [vmem:[%s733_s20] sm:$0xf] %v1962_v18  ;;  %v2803_v22 = vpop.f32.mrf.mxu1 }
 0x6cd   : > { %v1959_v23 = vpop.f32.mrf.mxu0 }
 0x6ce   : > { %v2017_v24 = vpop.f32.mrf.mxu1 }
 0x6cf   : > { %v2796_v25 = vpop.f32.mrf.mxu0 }
 0x6d0   : > { %v2804_v27 = vpop.f32.mrf.mxu1 }
 0x6d1   : > { %v2078_v28 = vpop.f32.mrf.mxu0 }
 0x6d2   : > { %v2084_v29 = vadd.f32 %v2078_v28, %v2020_v26 }
 0x6d3   : > { %v2811_v30 = vpop.f32.mrf.mxu0 }
 0x6d4   : > { %2540 = vst [vmem:[%s733_s20 + $0x4] sm:$0xf] %v2084_v29 }
 0x6d5   : > { %v2081_v31 = vpop.f32.mrf.mxu0 }
 0x6d7   : > { %v2812_v32 = vpop.f32.mrf.mxu0 }
 0x6d8 PF: > { %s25_s17 = sadd.s32 1, %s2961_s17   ;;  %s3375_s29 = smov %s2953_s15 }
 0x6d9   : > { %p22_p7 = scmp.ge.s32.totalorder %s25_s17, 6   ;;  %s3376_s30 = smov %s2957_s16 }
 0x6da   : > { %s3377_s15 = smov %s3380_s18  ;;  %s3378_s16 = smov %s3384_s19 }
 0x6db   :  { %24 = sbr.rel (!%p22_p7) target bundleno = 3 (0x3), region = 161 }

</bundles_post_ra>
